<compile_context>
chip_gen: v7x
topology: tpu7x:2x2x1
jax: 0.10.0
libtpu: 0.0.40
codegen_flags: <defaults>
</compile_context>

<pallas_src>
import jax
import jax.numpy as jnp
from jax.experimental import pallas as pl
from jax.experimental.pallas import tpu as pltpu


def _round_up(x: int, m: int) -> int:
    return ((x + m - 1) // m) * m


def _make_kernel(num_heads: int, tile_rows: int, n_valid: int,
                 needs_mask: bool, lane_exact: bool):
    def kernel(*refs):
        tgt_ref = refs[num_heads]
        out_ref = refs[num_heads + 1]

        t = tgt_ref[...].astype(jnp.float32)                 # (tile_rows, 128)

        if needs_mask:
            base_row = pl.program_id(0) * tile_rows
            row_ids = jax.lax.broadcasted_iota(jnp.int32, (tile_rows, 128), 0) + base_row
            if lane_exact:                                   # n % 128 == 0: row mask suffices
                mask = row_ids < (n_valid // 128)
            else:
                lane_ids = jax.lax.broadcasted_iota(jnp.int32, (tile_rows, 128), 1)
                mask = (row_ids * 128 + lane_ids) < n_valid
        else:
            mask = None

        acc8 = None
        for h in range(num_heads):                           # static unroll over heads
            x = refs[h][...].astype(jnp.float32)             # logits of head h
            # softplus(x) = max(x, 0) + log(1 + exp(-|x|))
            sp = jnp.maximum(x, 0.0) + jnp.log(1.0 + jnp.exp(-jnp.abs(x)))
            # t*min(sp-x,100) + (1-t)*min(sp,100)  ==  a + t*(b - a)   (torch -100 clamp exact)
            a = jnp.minimum(sp, 100.0)
            loss = a + t * (jnp.minimum(sp - x, 100.0) - a)
            if mask is not None:
                loss = jnp.where(mask, loss, 0.0)            # select kills OOB garbage / NaN
            # Fold straight to an (8,128) partial (pure VPU vreg adds, no XLU, no
            # full-tile accumulator carried across heads).
            part = jnp.sum(loss.reshape(tile_rows // 8, 8, 128), axis=0)
            acc8 = part if acc8 is None else acc8 + part

        out_ref[...] = acc8

    return kernel


def deep_supervised_loss(outputs, targets, *, tile_rows: int = 4096):
    """outputs: list of K (B, C, H, W) logit arrays; targets: (B, C, H, W)."""
    K = len(outputs)
    assert K >= 1
    n = int(targets.size)
    for o in outputs:
        assert int(o.size) == n, "every head must have the same number of elements as targets"

    if targets.dtype == jnp.bool_:                 # avoid 1-bit refs inside the kernel
        targets = targets.astype(jnp.float32)

    MULT = 32                                      # sublane multiple safe for f32/bf16/int8
    rows_raw = -(-n // 128)                        # ceil(n / 128)

    # ---- pick the row tile (big, VMEM-budgeted, sublane-aligned) -------------
    t_rows = min(int(tile_rows), _round_up(rows_raw, MULT))
    t_rows = max(MULT, _round_up(t_rows, MULT))

    TEMP_TILES = 8                                 # headroom for in-kernel f32 temporaries
    def _vmem_est(tr):                             # double-buffered inputs + temps
        return (2 * (K + 1) + TEMP_TILES) * tr * 128 * 4
    while t_rows > MULT and _vmem_est(t_rows) > (36 << 20):
        t_rows = max(MULT, _round_up(t_rows // 2, MULT))

    num_tiles = -(-rows_raw // t_rows)
    # v7x megacore: keep >= 2 parallel grid steps whenever the input allows it.
    if num_tiles == 1 and rows_raw > MULT:
        t_rows = max(MULT, _round_up(-(-rows_raw // 2), MULT))
        num_tiles = -(-rows_raw // t_rows)

    rows_view = max(rows_raw, t_rows)              # row count of the 2-D slab view
    needs_mask = (num_tiles * t_rows * 128 != n)   # any grid-covered element beyond n?
    lane_exact = (n % 128 == 0)

    def _slab(a):
        flat = a.reshape(-1)                       # free (contiguous) reshape, native dtype
        need = rows_view * 128
        if need != flat.shape[0]:
            # Only hit when n % 128 != 0 or the input is smaller than one tile.
            flat = jnp.pad(flat, (0, need - flat.shape[0]))
        return flat.reshape(rows_view, 128)

    in_specs = [pl.BlockSpec((t_rows, 128), lambda i: (i, 0)) for _ in range(K + 1)]

    bytes_accessed = sum(int(o.size) * o.dtype.itemsize for o in outputs)
    bytes_accessed += int(targets.size) * targets.dtype.itemsize
    bytes_accessed += num_tiles * 8 * 128 * 4

    partials = pl.pallas_call(
        _make_kernel(K, t_rows, n, needs_mask, lane_exact),
        out_shape=jax.ShapeDtypeStruct((num_tiles * 8, 128), jnp.float32),
        grid_spec=pltpu.PrefetchScalarGridSpec(
            num_scalar_prefetch=0,
            grid=(num_tiles,),
            in_specs=in_specs,
            out_specs=pl.BlockSpec((8, 128), lambda i: (i, 0)),
        ),
        compiler_params=pltpu.CompilerParams(
            dimension_semantics=("parallel",),     # independent tiles; megacore on v7x
            vmem_limit_bytes=int(min(_vmem_est(t_rows) + (8 << 20), 48 << 20)),
        ),
        cost_estimate=pl.CostEstimate(
            flops=11 * K * n,
            transcendentals=2 * K * n,
            bytes_accessed=int(bytes_accessed),
        ),
    )(*[_slab(o) for o in outputs], _slab(targets))

    # sum_k mean_k  ==  (sum over all heads & all elements) / n
    return jnp.sum(partials) / jnp.float32(n)


def _reference(outputs, targets):
    """Faithful to torch: BCE(sigmoid(x), t) with log clamped at -100, mean per head, summed."""
    t = targets.astype(jnp.float32)
    total = jnp.float32(0.0)
    for o in outputs:
        p = jax.nn.sigmoid(o.astype(jnp.float32))
        lp = jnp.maximum(jnp.log(p), -100.0)
        l1p = jnp.maximum(jnp.log1p(-p), -100.0)
        total = total + jnp.mean(-(t * lp + (1.0 - t) * l1p))
    return total


# TODO(synk): the loss_fn != None branch and the weighted _loss() helper (which
# references an undefined global `weight`) are not translated; only the
# loss_fn=None forward path is implemented.

if __name__ == "__main__":
    K = 3  # number of deep-supervision heads

    # Test 1: tiny input -> single tile, host pad + row mask path.
    B, C, H, W = 2, 1, 16, 16
    keys = jax.random.split(jax.random.PRNGKey(0), K + 1)
    outputs = [jax.random.normal(keys[i], (B, C, H, W), dtype=jnp.float32)
               for i in range(K)]
    targets = (jax.random.uniform(keys[K], (B, C, H, W)) > 0.5).astype(jnp.float32)

    loss = jax.block_until_ready(deep_supervised_loss(outputs, targets))
    ref = jax.block_until_ready(_reference(outputs, targets))
    assert jnp.allclose(loss, ref, rtol=1e-5, atol=1e-5), (loss, ref)

    # Test 2: multi-tile grid with a ragged (partial) last block, no host padding.
    B2, C2, H2, W2 = 2, 1, 48, 48
    keys2 = jax.random.split(jax.random.PRNGKey(1), K + 1)
    outputs2 = [jax.random.normal(keys2[i], (B2, C2, H2, W2), dtype=jnp.float32)
                for i in range(K)]
    targets2 = (jax.random.uniform(keys2[K], (B2, C2, H2, W2)) > 0.5).astype(jnp.float32)

    loss2 = jax.block_until_ready(
        deep_supervised_loss(outputs2, targets2, tile_rows=16))
    ref2 = jax.block_until_ready(_reference(outputs2, targets2))
    assert jnp.allclose(loss2, ref2, rtol=1e-5, atol=1e-5), (loss2, ref2)

    # Test 3: bf16 logits passed through in native dtype, exact 2-tile split, no mask.
    B3, C3, H3, W3 = 2, 1, 64, 64
    keys3 = jax.random.split(jax.random.PRNGKey(2), K + 1)
    outputs3 = [jax.random.normal(keys3[i], (B3, C3, H3, W3), dtype=jnp.float32
                                  ).astype(jnp.bfloat16) for i in range(K)]
    targets3 = (jax.random.uniform(keys3[K], (B3, C3, H3, W3)) > 0.5).astype(jnp.float32)

    loss3 = jax.block_until_ready(deep_supervised_loss(outputs3, targets3))
    ref3 = jax.block_until_ready(_reference(outputs3, targets3))
    assert jnp.allclose(loss3, ref3, rtol=1e-5, atol=1e-5), (loss3, ref3)

    print("KERNEL_OK")
</pallas_src>

<mosaic_0001>
module attributes {stable_mosaic.version = 11 : i64} {
  func.func @kernel(%arg0: i32, %arg1: memref<32x128xf32, #tpu.memory_space<vmem>>, %arg2: memref<32x128xf32, #tpu.memory_space<vmem>>, %arg3: memref<32x128xf32, #tpu.memory_space<vmem>>, %arg4: memref<32x128xf32, #tpu.memory_space<vmem>>, %arg5: memref<8x128xf32, #tpu.memory_space<vmem>>) attributes {dimension_semantics = [#tpu.dimension_semantics<parallel>], iteration_bounds = array<i64: 1>, scalar_prefetch = 0 : i64, scratch_operands = 0 : i64, tpu.core_type = #tpu.core_type<tc>, window_params = [{transform_indices = @transform_0, window_bounds = array<i64: 32, 128>}, {transform_indices = @transform_1, window_bounds = array<i64: 32, 128>}, {transform_indices = @transform_2, window_bounds = array<i64: 32, 128>}, {transform_indices = @transform_3, window_bounds = array<i64: 32, 128>}, {transform_indices = @transform_4, window_bounds = array<i64: 8, 128>}]} {
    %c0 = arith.constant 0 : index
    %c0_0 = arith.constant 0 : index
    %0 = vector.load %arg4[%c0, %c0_0] : memref<32x128xf32, #tpu.memory_space<vmem>>, vector<32x128xf32>
    %c32_i32 = arith.constant 32 : i32
    %1 = arith.muli %arg0, %c32_i32 : i32
    %2 = tpu.iota {dimensions = array<i32: 0>} : vector<32x128xi32>
    %3 = vector.broadcast %1 : i32 to vector<32x128xi32>
    %4 = arith.addi %2, %3 : vector<32x128xi32>
    %c4_i32 = arith.constant 4 : i32
    %5 = vector.broadcast %c4_i32 : i32 to vector<32x128xi32>
    %6 = arith.cmpi slt, %4, %5 : vector<32x128xi32>
    %c0_1 = arith.constant 0 : index
    %c0_2 = arith.constant 0 : index
    %7 = vector.load %arg1[%c0_1, %c0_2] : memref<32x128xf32, #tpu.memory_space<vmem>>, vector<32x128xf32>
    %cst = arith.constant 0.000000e+00 : f32
    %8 = vector.broadcast %cst : f32 to vector<32x128xf32>
    %9 = arith.maximumf %7, %8 : vector<32x128xf32>
    %10 = math.absf %7 : vector<32x128xf32>
    %cst_3 = arith.constant 0.000000e+00 : f32
    %11 = vector.broadcast %cst_3 : f32 to vector<32x128xf32>
    %12 = arith.subf %11, %10 : vector<32x128xf32>
    %13 = math.exp %12 : vector<32x128xf32>
    %cst_4 = arith.constant 1.000000e+00 : f32
    %14 = vector.broadcast %cst_4 : f32 to vector<32x128xf32>
    %15 = arith.addf %14, %13 : vector<32x128xf32>
    %16 = math.log %15 : vector<32x128xf32>
    %17 = arith.addf %9, %16 : vector<32x128xf32>
    %cst_5 = arith.constant 1.000000e+02 : f32
    %18 = vector.broadcast %cst_5 : f32 to vector<32x128xf32>
    %19 = arith.minimumf %17, %18 : vector<32x128xf32>
    %20 = arith.subf %17, %7 : vector<32x128xf32>
    %cst_6 = arith.constant 1.000000e+02 : f32
    %21 = vector.broadcast %cst_6 : f32 to vector<32x128xf32>
    %22 = arith.minimumf %20, %21 : vector<32x128xf32>
    %23 = arith.subf %22, %19 : vector<32x128xf32>
    %24 = arith.mulf %0, %23 : vector<32x128xf32>
    %25 = arith.addf %19, %24 : vector<32x128xf32>
    %cst_7 = arith.constant 0.000000e+00 : f32
    %26 = vector.broadcast %cst_7 : f32 to vector<32x128xf32>
    %27 = arith.select %6, %25, %26 : vector<32x128xi1>, vector<32x128xf32>
    %28 = vector.shape_cast %27 : vector<32x128xf32> to vector<4x8x128xf32>
    %cst_8 = arith.constant dense<0.000000e+00> : vector<8x128xf32>
    %29 = vector.multi_reduction <add>, %28, %cst_8 [0] : vector<4x8x128xf32> to vector<8x128xf32>
    %c0_9 = arith.constant 0 : index
    %c0_10 = arith.constant 0 : index
    %30 = vector.load %arg2[%c0_9, %c0_10] : memref<32x128xf32, #tpu.memory_space<vmem>>, vector<32x128xf32>
    %cst_11 = arith.constant 0.000000e+00 : f32
    %31 = vector.broadcast %cst_11 : f32 to vector<32x128xf32>
    %32 = arith.maximumf %30, %31 : vector<32x128xf32>
    %33 = math.absf %30 : vector<32x128xf32>
    %cst_12 = arith.constant 0.000000e+00 : f32
    %34 = vector.broadcast %cst_12 : f32 to vector<32x128xf32>
    %35 = arith.subf %34, %33 : vector<32x128xf32>
    %36 = math.exp %35 : vector<32x128xf32>
    %cst_13 = arith.constant 1.000000e+00 : f32
    %37 = vector.broadcast %cst_13 : f32 to vector<32x128xf32>
    %38 = arith.addf %37, %36 : vector<32x128xf32>
    %39 = math.log %38 : vector<32x128xf32>
    %40 = arith.addf %32, %39 : vector<32x128xf32>
    %cst_14 = arith.constant 1.000000e+02 : f32
    %41 = vector.broadcast %cst_14 : f32 to vector<32x128xf32>
    %42 = arith.minimumf %40, %41 : vector<32x128xf32>
    %43 = arith.subf %40, %30 : vector<32x128xf32>
    %cst_15 = arith.constant 1.000000e+02 : f32
    %44 = vector.broadcast %cst_15 : f32 to vector<32x128xf32>
    %45 = arith.minimumf %43, %44 : vector<32x128xf32>
    %46 = arith.subf %45, %42 : vector<32x128xf32>
    %47 = arith.mulf %0, %46 : vector<32x128xf32>
    %48 = arith.addf %42, %47 : vector<32x128xf32>
    %cst_16 = arith.constant 0.000000e+00 : f32
    %49 = vector.broadcast %cst_16 : f32 to vector<32x128xf32>
    %50 = arith.select %6, %48, %49 : vector<32x128xi1>, vector<32x128xf32>
    %51 = vector.shape_cast %50 : vector<32x128xf32> to vector<4x8x128xf32>
    %cst_17 = arith.constant dense<0.000000e+00> : vector<8x128xf32>
    %52 = vector.multi_reduction <add>, %51, %cst_17 [0] : vector<4x8x128xf32> to vector<8x128xf32>
    %53 = arith.addf %29, %52 : vector<8x128xf32>
    %c0_18 = arith.constant 0 : index
    %c0_19 = arith.constant 0 : index
    %54 = vector.load %arg3[%c0_18, %c0_19] : memref<32x128xf32, #tpu.memory_space<vmem>>, vector<32x128xf32>
    %cst_20 = arith.constant 0.000000e+00 : f32
    %55 = vector.broadcast %cst_20 : f32 to vector<32x128xf32>
    %56 = arith.maximumf %54, %55 : vector<32x128xf32>
    %57 = math.absf %54 : vector<32x128xf32>
    %cst_21 = arith.constant 0.000000e+00 : f32
    %58 = vector.broadcast %cst_21 : f32 to vector<32x128xf32>
    %59 = arith.subf %58, %57 : vector<32x128xf32>
    %60 = math.exp %59 : vector<32x128xf32>
    %cst_22 = arith.constant 1.000000e+00 : f32
    %61 = vector.broadcast %cst_22 : f32 to vector<32x128xf32>
    %62 = arith.addf %61, %60 : vector<32x128xf32>
    %63 = math.log %62 : vector<32x128xf32>
    %64 = arith.addf %56, %63 : vector<32x128xf32>
    %cst_23 = arith.constant 1.000000e+02 : f32
    %65 = vector.broadcast %cst_23 : f32 to vector<32x128xf32>
    %66 = arith.minimumf %64, %65 : vector<32x128xf32>
    %67 = arith.subf %64, %54 : vector<32x128xf32>
    %cst_24 = arith.constant 1.000000e+02 : f32
    %68 = vector.broadcast %cst_24 : f32 to vector<32x128xf32>
    %69 = arith.minimumf %67, %68 : vector<32x128xf32>
    %70 = arith.subf %69, %66 : vector<32x128xf32>
    %71 = arith.mulf %0, %70 : vector<32x128xf32>
    %72 = arith.addf %66, %71 : vector<32x128xf32>
    %cst_25 = arith.constant 0.000000e+00 : f32
    %73 = vector.broadcast %cst_25 : f32 to vector<32x128xf32>
    %74 = arith.select %6, %72, %73 : vector<32x128xi1>, vector<32x128xf32>
    %75 = vector.shape_cast %74 : vector<32x128xf32> to vector<4x8x128xf32>
    %cst_26 = arith.constant dense<0.000000e+00> : vector<8x128xf32>
    %76 = vector.multi_reduction <add>, %75, %cst_26 [0] : vector<4x8x128xf32> to vector<8x128xf32>
    %77 = arith.addf %53, %76 : vector<8x128xf32>
    %c0_27 = arith.constant 0 : index
    %c0_28 = arith.constant 0 : index
    %78 = vector.load %arg5[%c0_27, %c0_28] : memref<8x128xf32, #tpu.memory_space<vmem>>, vector<8x128xf32>
    tpu.vector_store %arg5[%c0_27, %c0_28], %77 {strides = array<i32>} : memref<8x128xf32, #tpu.memory_space<vmem>>, vector<8x128xf32>,
    return
  }
  func.func @transform_0(%arg0: i32) -> (i32, i32) {
    %c0_i32 = arith.constant 0 : i32
    %c0_i32_0 = arith.constant 0 : i32
    return %arg0, %c0_i32 : i32, i32
  }
  func.func @transform_1(%arg0: i32) -> (i32, i32) {
    %c0_i32 = arith.constant 0 : i32
    %c0_i32_0 = arith.constant 0 : i32
    return %arg0, %c0_i32 : i32, i32
  }
  func.func @transform_2(%arg0: i32) -> (i32, i32) {
    %c0_i32 = arith.constant 0 : i32
    %c0_i32_0 = arith.constant 0 : i32
    return %arg0, %c0_i32 : i32, i32
  }
  func.func @transform_3(%arg0: i32) -> (i32, i32) {
    %c0_i32 = arith.constant 0 : i32
    %c0_i32_0 = arith.constant 0 : i32
    return %arg0, %c0_i32 : i32, i32
  }
  func.func @transform_4(%arg0: i32) -> (i32, i32) {
    %c0_i32 = arith.constant 0 : i32
    %c0_i32_0 = arith.constant 0 : i32
    return %arg0, %c0_i32 : i32, i32
  }
}

</mosaic_0001>

<bundles_post_ra>
// kernel: tpu_custom_call.1
= control target key start
LH: loop header
LB: loop body
LE: loop exit
PB: predicated region body
PF: predicated region fallthrough
CT: control target
= control target key end

     0   :  { %9 = vsyncpa [#allocation3], 0  ;;  %s580_s0 = inlined_call_operand.hbm [shape: f32[32,128], index: 0, kind: input, shape index: {}]   ;;  %s581_s1 = inlined_call_operand.hbm [shape: f32[32,128], index: 1, kind: input, shape index: {}]   ;;  %s582_s2 = inlined_call_operand.hbm [shape: f32[32,128], index: 2, kind: input, shape index: {}]   ;;  %s583_s3 = inlined_call_operand.hbm [shape: f32[32,128], index: 3, kind: input, shape index: {}]   ;;  %s584_s4 = inlined_call_operand.hbm [shape: f32[8,128], index: 4, kind: output, shape index: {}]  }
   0x1   :  { %10 = vsyncpa [#allocation6], 0 }
   0x2   :  { %11 = vsyncpa [#allocation9], 0 }
   0x3   :  { %12 = vsyncpa [#allocation4], 0  ;;  %s462_s15 = smov [#allocation5]   ;;  %s463_s17 = smov [#allocation2]  }
   0x4   :  { %s30_s16 = sshll.u32 %s462_s15, 4  ;;  %s18_s18 = sshll.u32 %s463_s17, 4  ;;  %s31_s16 = int_to_ptr.vmem [resolvable:$true] %s30_s16  ;;  %s494_s18 = int_to_ptr.vmem [resolvable:$true] %s18_s18 }
   0x5   :  { %s344_s21 = scalar_lea.hbm %s581_s1, 512 }
   0x6   :  { %p345_p0 = scmp.ne.s32.totalorder %s581_s1, %s344_s21  ;;  %p348_p1 = scmp.lt.u32.totalorder %s344_s21, %s581_s1 }
   0x8   :  { %p350_p2 = pnand %p348_p1, %p345_p0 }
   0xa   :  { %353 = shalt.err (!%p350_p2)
}
   0xb   :  { %s354_s26 = scalar_lea.vmem %s31_s16, 512  ;;  %p359_p4 = scmp.lt.s32.totalorder %s31_s16, %s31_s16 }
   0xc   :  { %p355_p3 = scmp.ne.s32.totalorder %s31_s16, %s354_s26  ;;  %p360_p5 = scmp.lt.s32.totalorder %s354_s26, %s354_s26 }
   0xe   :  { %p361_p6 = por %p360_p5, %p359_p4 }
  0x10   :  { %p362_p7 = pnand %p361_p6, %p355_p3 }
  0x12   :  { %365 = shalt.err (!%p362_p7)
}
  0x13   :  { %s464_s27 = smov 128   ;;  %s465_s28 = smov 8  }
  0x14   :  { %36 = dma.hbm_to_vmem [thread:$0]  %s581_s1, 512, %s31_s16, [#allocation6], %s464_s27, %s464_s27, %s465_s28  }
  0x15   :  { %s366_s7 = scalar_lea.hbm %s580_s0, 512 }
  0x16   :  { %p367_p8 = scmp.ne.s32.totalorder %s580_s0, %s366_s7  ;;  %p370_p9 = scmp.lt.u32.totalorder %s366_s7, %s580_s0 }
  0x18   :  { %p372_p10 = pnand %p370_p9, %p367_p8 }
  0x1a   :  { %375 = shalt.err (!%p372_p10)
}
  0x1b   :  { %s376_s12 = scalar_lea.vmem %s494_s18, 512  ;;  %p381_p12 = scmp.lt.s32.totalorder %s494_s18, %s494_s18 }
  0x1c   :  { %p377_p11 = scmp.ne.s32.totalorder %s494_s18, %s376_s12  ;;  %p382_p13 = scmp.lt.s32.totalorder %s376_s12, %s376_s12 }
  0x1e   :  { %p383_p0 = por %p382_p13, %p381_p12 }
  0x20   :  { %p384_p1 = pnand %p383_p0, %p377_p11 }
  0x22   :  { %387 = shalt.err (!%p384_p1)
}
  0x23   :  { %24 = dma.hbm_to_vmem [thread:$0]  %s580_s0, 512, %s494_s18, [#allocation3], %s464_s27, %s464_s27, %s465_s28  }
  0x24   :  { %s466_s14 = smov [#allocation7]   ;;  %s467_s16 = smov [#allocation8]  }
  0x25   :  { %s42_s15 = sshll.u32 %s466_s14, 4  ;;  %s54_s17 = sshll.u32 %s467_s16, 4  ;;  %s43_s15 = int_to_ptr.vmem [resolvable:$true] %s42_s15  ;;  %s531_s17 = int_to_ptr.vmem [resolvable:$true] %s54_s17 }
  0x26   :  { %s388_s21 = scalar_lea.hbm %s582_s2, 512 }
  0x27   :  { %p389_p2 = scmp.ne.s32.totalorder %s582_s2, %s388_s21  ;;  %p392_p3 = scmp.lt.u32.totalorder %s388_s21, %s582_s2 }
  0x29   :  { %p394_p4 = pnand %p392_p3, %p389_p2 }
  0x2b   :  { %397 = shalt.err (!%p394_p4)
}
  0x2c   :  { %s398_s0 = scalar_lea.vmem %s43_s15, 512  ;;  %p403_p6 = scmp.lt.s32.totalorder %s43_s15, %s43_s15 }
  0x2d   :  { %p399_p5 = scmp.ne.s32.totalorder %s43_s15, %s398_s0  ;;  %p404_p7 = scmp.lt.s32.totalorder %s398_s0, %s398_s0 }
  0x2f   :  { %p405_p8 = por %p404_p7, %p403_p6 }
  0x31   :  { %p406_p9 = pnand %p405_p8, %p399_p5 }
  0x33   :  { %409 = shalt.err (!%p406_p9)
}
  0x34   :  { %48 = dma.hbm_to_vmem [thread:$0]  %s582_s2, 512, %s43_s15, [#allocation6], %s464_s27, %s464_s27, %s465_s28  }
  0x35   :  { %s410_s5 = scalar_lea.hbm %s583_s3, 512 }
  0x36   :  { %p411_p10 = scmp.ne.s32.totalorder %s583_s3, %s410_s5  ;;  %p414_p11 = scmp.lt.u32.totalorder %s410_s5, %s583_s3 }
  0x38   :  { %p416_p12 = pnand %p414_p11, %p411_p10 }
  0x3a   :  { %419 = shalt.err (!%p416_p12)
}
  0x3b   :  { %s420_s10 = scalar_lea.vmem %s531_s17, 512  ;;  %p425_p0 = scmp.lt.s32.totalorder %s531_s17, %s531_s17 }
  0x3c   :  { %p421_p13 = scmp.ne.s32.totalorder %s531_s17, %s420_s10  ;;  %p426_p1 = scmp.lt.s32.totalorder %s420_s10, %s420_s10 }
  0x3e   :  { %p427_p2 = por %p426_p1, %p425_p0 }
  0x40   :  { %p428_p3 = pnand %p427_p2, %p421_p13 }
  0x42   :  { %431 = shalt.err (!%p428_p3)
}
  0x43   :  { %60 = dma.hbm_to_vmem [thread:$0]  %s583_s3, 512, %s531_s17, [#allocation9], %s464_s27, %s464_s27, %s465_s28  }
  0x44   :  { %454 = dma.done.wait [#allocation3], 512  }
  0x45   :  { %455 = vsyncadd [#allocation3], 4294966784 }
  0x46   :  { %456 = dma.done.wait [#allocation6], 1024  }
  0x47   :  { %457 = vsyncadd [#allocation6], 4294966272 }
  0x48   :  { %458 = dma.done.wait [#allocation9], 512  }
  0x49   :  { %459 = vsyncadd [#allocation9], 4294966784  ;;  %v92_v0 = vld [vmem:[#allocation2] sm:$0xff]  ;;  %v78_v28 = vlaneseq  ;;  %s468_s3 = smov [#allocation10]  }
  0x4a   :  { %v163_v1 = vld [vmem:[#allocation5] sm:$0xff]  ;;  %v100_v2 = vand.u32 2147483647, %v92_v0  ;;  %v96_v18 = vmax.f32 %v92_v0, 0.0  ;;  %s314_s27 = sshll.u32 %s468_s3, 4  ;;  %s315_s27 = int_to_ptr.vmem [resolvable:$true] %s314_s27 }
  0x4b   :  { %v171_v3 = vand.u32 2147483647, %v163_v1  ;;  %v235_v4 = vld [vmem:[#allocation7] sm:$0xff]  ;;  %v167_v20 = vmax.f32 %v163_v1, 0.0  ;;  %v79_v39 = vshrl.u32 %v78_v28, 7  ;;  %s432_s28 = scalar_lea.vmem %s315_s27, 128  ;;  %p437_p5 = scmp.lt.s32.totalorder %s315_s27, %s315_s27 }
  0x4c   :  { %v104_v5 = vsub.f32 0.0, %v100_v2  ;;  %v243_v7 = vand.u32 2147483647, %v235_v4  ;;  %v239_v23 = vmax.f32 %v235_v4, 0.0  ;;  %v73_v38 = vld [vmem:[#allocation8] sm:$0xff]  ;;  %p433_p4 = scmp.ne.s32.totalorder %s315_s27, %s432_s28  ;;  %p438_p6 = scmp.lt.s32.totalorder %s432_s28, %s432_s28 }
  0x4d   :  { %v175_v6 = vsub.f32 0.0, %v171_v3  ;;  %vm88_vm0 = vcmp.lt.s32.totalorder %v79_v39, 4 }
  0x4e   :  { %v108_v8 = vmul.f32 1.442695, %v104_v5  ;;  %v247_v10 = vsub.f32 0.0, %v243_v7  ;;  %p439_p7 = por %p438_p6, %p437_p5 }
  0x4f   :  { %v179_v9 = vmul.f32 1.442695, %v175_v6 }
  0x50   :  { %332 = vpow2.f32 %v108_v8  ;;  %v251_v11 = vmul.f32 1.442695, %v247_v10  ;;  %p440_p8 = pnand %p439_p7, %p433_p4 }
  0x51   :  { %334 = vpow2.f32 %v179_v9 }
  0x52   :  { %336 = vpow2.f32 %v251_v11 }
  0x5a   :  { %v333_v12 = vpop.eup %332 }
  0x5b   :  { %v335_v13 = vpop.eup %334  ;;  %v116_v14 = vadd.f32 1.0, %v333_v12 }
  0x5c   :  { %v337_v15 = vpop.eup %336  ;;  %v187_v16 = vadd.f32 1.0, %v335_v13 }
  0x5d   :  { %338 = vlog2.f32 %v116_v14  ;;  %v259_v17 = vadd.f32 1.0, %v337_v15 }
  0x5e   :  { %340 = vlog2.f32 %v187_v16 }
  0x5f   :  { %342 = vlog2.f32 %v259_v17 }
  0x67   :  { %v339_v19 = vpop.eup %338 }
  0x68   :  { %v341_v21 = vpop.eup %340  ;;  %v121_v22 = vmul.f32 0.6931472, %v339_v19 }
  0x69   :  { %v343_v24 = vpop.eup %342  ;;  %v192_v25 = vmul.f32 0.6931472, %v341_v21 }
  0x6a   :  { %v128_v26 = vadd.f32 %v121_v22, %v96_v18  ;;  %v264_v27 = vmul.f32 0.6931472, %v343_v24 }
  0x6b   :  { %v199_v29 = vadd.f32 %v192_v25, %v167_v20 }
  0x6c   :  { %v132_v30 = vmin.f32 %v128_v26, 100.0  ;;  %v136_v31 = vsub.f32 %v128_v26, %v92_v0  ;;  %v271_v32 = vadd.f32 %v264_v27, %v239_v23 }
  0x6d   :  { %v203_v33 = vmin.f32 %v199_v29, 100.0  ;;  %v207_v34 = vsub.f32 %v199_v29, %v163_v1 }
  0x6e   :  { %v140_v35 = vmin.f32 %v136_v31, 100.0  ;;  %v275_v36 = vmin.f32 %v271_v32, 100.0  ;;  %v279_v37 = vsub.f32 %v271_v32, %v235_v4 }
  0x6f   :  { %v211_v40 = vmin.f32 %v207_v34, 100.0 }
  0x70   :  { %v144_v41 = vsub.f32 %v140_v35, %v132_v30  ;;  %v283_v42 = vmin.f32 %v279_v37, 100.0 }
  0x71   :  { %v215_v43 = vsub.f32 %v211_v40, %v203_v33 }
  0x72   :  { %v148_v44 = vmul.f32 %v144_v41, %v73_v38  ;;  %v287_v45 = vsub.f32 %v283_v42, %v275_v36 }
  0x73   :  { %v219_v46 = vmul.f32 %v215_v43, %v73_v38 }
  0x74   :  { %v152_v47 = vadd.f32 %v148_v44, %v132_v30  ;;  %v291_v48 = vmul.f32 %v287_v45, %v73_v38 }
  0x75   :  { %v223_v49 = vadd.f32 %v219_v46, %v203_v33 }
  0x76   :  { %v156_v50 = vsel %vm88_vm0, %v152_v47, 0.0  ;;  %v295_v51 = vadd.f32 %v291_v48, %v275_v36 }
  0x77   :  { %v227_v52 = vsel %vm88_vm0, %v223_v49, 0.0 }
  0x78   :  { %v234_v53 = vadd.f32 %v227_v52, %v156_v50  ;;  %v299_v54 = vsel %vm88_vm0, %v295_v51, 0.0 }
  0x7a   :  { %v306_v55 = vadd.f32 %v299_v54, %v234_v53 }
  0x7c   :  { %307 = vst [vmem:[#allocation10] sm:$0xff] %v306_v55 }
  0x7d   :  { %443 = shalt.err (!%p440_p8)
}
  0x7e   :  { %s444_s13 = scalar_lea.hbm %s584_s4, 128 }
  0x7f   :  { %p445_p9 = scmp.ne.s32.totalorder %s584_s4, %s444_s13  ;;  %p448_p10 = scmp.lt.u32.totalorder %s444_s13, %s584_s4 }
  0x81   :  { %p450_p11 = pnand %p448_p10, %p445_p9 }
  0x83   :  { %453 = shalt.err (!%p450_p11)
}
  0x84   :  { %317 = dma.vmem_to_hbm [thread:$0]  %s315_s27, 128, %s584_s4, [#allocation4]  }
  0x85   :  { %460 = dma.done.wait [#allocation4], 128  }
  0x86   :  { %461 = vsyncadd [#allocation4], 4294967168 }
  0x87   :  { %321 = vsyncpa [#allocation3], 1 }
  0x88   :  { %322 = vsyncpa [#allocation6], 1 }
  0x89   :  { %323 = vsyncpa [#allocation9], 1 }
  0x8a   :  { %324 = vsyncpa [#allocation4], 1 }

</bundles_post_ra>
